<compile_context>
chip_gen: v7x
topology: tpu7x:2x2x1
jax: 0.10.0
libtpu: 0.0.40
codegen_flags: <defaults>
</compile_context>

<pallas_src>
import functools

import jax
import jax.numpy as jnp
from jax.experimental import pallas as pl
from jax.experimental.pallas import tpu as pltpu

LANES = 128      # TPU lane width (last dim of every vreg)
SUBLANES = 8     # f32 sublanes per vreg
ROW_ALIGN = 16   # row padding / block alignment unit (covers f32 and bf16 tiles)
NUM_CORES = 2    # v7x megacore; a length-2 "parallel" axis is free on 1-TC chips


def _round_up(x, m):
    return ((x + m - 1) // m) * m


def _bce_blur_kernel(pred_ref, true_ref, out_ref, acc_ref, *,
                     inv_alpha, tail_valid, n_valid_blocks, steps_per_core,
                     block_rows, needs_mask, has_oob_blocks):
    c = pl.program_id(0)            # core (parallel) axis
    i = pl.program_id(1)            # per-core streaming / reduction axis
    g = c * steps_per_core + i      # global block index

    @pl.when(i == 0)
    def _():
        acc_ref[...] = jnp.zeros_like(acc_ref)

    def accumulate(mask_tail):
        x = pred_ref[...].astype(jnp.float32)   # logits
        z = true_ref[...].astype(jnp.float32)   # targets
        e = jnp.exp(-jnp.abs(x))
        # Numerically stable BCEWithLogits: max(x,0) - x*z + log(1 + exp(-|x|))
        bce = jnp.maximum(x, 0.0) - x * z + jnp.log(1.0 + e)
        # sigmoid(x) = 0.5*tanh(x/2) + 0.5  (single EUP op, no divide)
        p = 0.5 * jnp.tanh(0.5 * x) + 0.5
        loss = bce * (1.0 - jnp.exp((p - z - 1.0) * inv_alpha))
        if mask_tail:
            # Block-local static threshold: no program_id arithmetic, no
            # int32 overflow risk; select (not multiply) so garbage/pad rows
            # (possibly NaN/inf after the math above) are dropped safely.
            r = jax.lax.broadcasted_iota(jnp.int32, loss.shape, 0)
            l = jax.lax.broadcasted_iota(jnp.int32, loss.shape, 1)
            loss = jnp.where(r * LANES + l < tail_valid, loss, 0.0)
        # Fold the block into an (8,128) vreg-shaped partial: the reshape splits
        # the sublane dim cleanly (no (8,128)-tile crossing) and the axis-0 sum
        # is block_rows/8 plain VPU vreg adds.
        acc_ref[...] += loss.reshape(block_rows // SUBLANES, SUBLANES, LANES).sum(axis=0)

    if needs_mask:
        @pl.when(g < n_valid_blocks - 1)
        def _():
            accumulate(False)

        @pl.when(g == n_valid_blocks - 1)
        def _():
            accumulate(True)
    elif has_oob_blocks:
        @pl.when(g < n_valid_blocks)
        def _():
            accumulate(False)
    else:
        accumulate(False)

    @pl.when(i == pl.num_programs(1) - 1)
    def _():
        out_ref[0, :, :] = acc_ref[...]


def bce_blur_with_logits_loss(pred, true, alpha=0.05, block_rows=8192):
    """Pallas implementation of BCEBlurWithLogitsLoss.forward. Returns scalar."""
    assert pred.shape == true.shape
    n = pred.size
    inv_alpha = float(1.0 / (alpha + 1e-4))

    pred_f = pred.reshape(-1)
    true_f = true.reshape(-1)
    itemsize = max(jnp.dtype(pred_f.dtype).itemsize, jnp.dtype(true_f.dtype).itemsize)

    # Lane-dense slab; rows padded to a multiple of 16 (f32 & bf16 friendly).
    # The pad copy only happens for ragged sizes; the common aligned case
    # streams the caller's buffers directly without re-materializing them.
    rows = _round_up(pl.cdiv(n, LANES), ROW_ALIGN)
    pad = rows * LANES - n
    if pad:
        pred_f = jnp.pad(pred_f, (0, pad))
        true_f = jnp.pad(true_f, (0, pad))
    pred2 = pred_f.reshape(rows, LANES)
    true2 = true_f.reshape(rows, LANES)

    # Block sizing: big blocks amortize the per-step grid overhead; cap the
    # 2-input x 2-buffer footprint at ~32 MiB so full double-buffering fits
    # v7x's 64 MiB VMEM (and comfortably v5e/v6e) without spills.
    max_block_rows = (32 * 2**20) // (2 * 2 * LANES * itemsize)
    block_rows = min(block_rows, max_block_rows, rows)
    block_rows = max(ROW_ALIGN, (block_rows // ROW_ALIGN) * ROW_ALIGN)

    n_valid_blocks = pl.cdiv(rows, block_rows)
    block_elems = block_rows * LANES
    tail_valid = n - (n_valid_blocks - 1) * block_elems   # valid elems in last block
    needs_mask = tail_valid != block_elems

    # Shard the block stream across TensorCores (v7x); on single-TC chips the
    # parallel axis just iterates sequentially with the same total step count.
    num_cores = NUM_CORES if n_valid_blocks >= NUM_CORES else 1
    steps_per_core = pl.cdiv(n_valid_blocks, num_cores)
    has_oob_blocks = num_cores * steps_per_core != n_valid_blocks

    def in_index_map(c, i):
        # Clamp so the (at most one) padding block never indexes past the array.
        return (jnp.minimum(c * steps_per_core + i, n_valid_blocks - 1), 0)

    kernel = functools.partial(
        _bce_blur_kernel, inv_alpha=inv_alpha, tail_valid=tail_valid,
        n_valid_blocks=n_valid_blocks, steps_per_core=steps_per_core,
        block_rows=block_rows, needs_mask=needs_mask,
        has_oob_blocks=has_oob_blocks)

    compiler_kwargs = dict(dimension_semantics=("parallel", "arbitrary"))
    input_buffer_bytes = 2 * 2 * block_rows * LANES * itemsize
    if input_buffer_bytes > 12 * 2**20:
        # Above v5e's 16 MiB default scoped-VMEM limit; 40 MiB is safe on all
        # generations (physical VMEM: 128 MiB v5e/v6e, 64 MiB v7x).
        compiler_kwargs["vmem_limit_bytes"] = 40 * 2**20

    partial_sums = pl.pallas_call(
        kernel,
        out_shape=jax.ShapeDtypeStruct((num_cores, SUBLANES, LANES), jnp.float32),
        grid_spec=pltpu.PrefetchScalarGridSpec(
            num_scalar_prefetch=0,
            grid=(num_cores, steps_per_core),
            in_specs=[
                pl.BlockSpec((block_rows, LANES), in_index_map),
                pl.BlockSpec((block_rows, LANES), in_index_map),
            ],
            out_specs=pl.BlockSpec((1, SUBLANES, LANES), lambda c, i: (c, 0, 0)),
            scratch_shapes=[pltpu.VMEM((SUBLANES, LANES), jnp.float32)],
        ),
        compiler_params=pltpu.CompilerParams(**compiler_kwargs),
    )(pred2, true2)

    # Tiny final cross-lane reduction + mean done in plain XLA.
    return jnp.sum(partial_sums) / jnp.float32(n)


def _reference(pred, true, alpha=0.05):
    x = pred.astype(jnp.float32)
    z = true.astype(jnp.float32)
    loss = jnp.maximum(x, 0.0) - x * z + jnp.log1p(jnp.exp(-jnp.abs(x)))
    p = jax.nn.sigmoid(x)
    loss = loss * (1.0 - jnp.exp((p - z - 1.0) / (alpha + 1e-4)))
    return jnp.mean(loss)


if __name__ == "__main__":
    key = jax.random.PRNGKey(0)
    k1, k2, k3, k4, k5, k6 = jax.random.split(key, 6)

    # Case 1: NCHW logits/targets, aligned element count (fast path: no pad,
    # no masking, single block, single core-slice).
    pred = jax.random.normal(k1, (2, 4, 16, 16), dtype=jnp.float32)
    true = (jax.random.uniform(k2, (2, 4, 16, 16)) > 0.5).astype(jnp.float32)
    out = jax.block_until_ready(bce_blur_with_logits_loss(pred, true, alpha=0.05))
    ref = _reference(pred, true, alpha=0.05)
    assert jnp.allclose(out, ref, atol=1e-5, rtol=1e-5), (out, ref)

    # Case 2: ragged element count -> padded slab, two cores, masked tail block.
    pred2 = jax.random.normal(k3, (2, 4, 19, 20), dtype=jnp.float32)
    true2 = (jax.random.uniform(k4, (2, 4, 19, 20)) > 0.5).astype(jnp.float32)
    out2 = jax.block_until_ready(
        bce_blur_with_logits_loss(pred2, true2, alpha=0.05, block_rows=16))
    ref2 = _reference(pred2, true2, alpha=0.05)
    assert jnp.allclose(out2, ref2, atol=1e-5, rtol=1e-5), (out2, ref2)

    # Case 3: odd number of blocks -> one fully-padding block (skip path) plus
    # multi-step accumulation per core and a masked tail block.
    pred3 = jax.random.normal(k5, (3, 4, 19, 20), dtype=jnp.float32)
    true3 = (jax.random.uniform(k6, (3, 4, 19, 20)) > 0.5).astype(jnp.float32)
    out3 = jax.block_until_ready(
        bce_blur_with_logits_loss(pred3, true3, alpha=0.05, block_rows=16))
    ref3 = _reference(pred3, true3, alpha=0.05)
    assert jnp.allclose(out3, ref3, atol=1e-5, rtol=1e-5), (out3, ref3)

    print("KERNEL_OK")
</pallas_src>

<mosaic_0001>
module attributes {stable_mosaic.version = 11 : i64} {
  func.func @_bce_blur_kernel(%arg0: i32, %arg1: i32, %arg2: memref<16x128xf32, #tpu.memory_space<vmem>>, %arg3: memref<16x128xf32, #tpu.memory_space<vmem>>, %arg4: memref<1x8x128xf32, #tpu.memory_space<vmem>>, %arg5: memref<8x128xf32, #tpu.memory_space<vmem>>) attributes {dimension_semantics = [#tpu.dimension_semantics<parallel>, #tpu.dimension_semantics<arbitrary>], iteration_bounds = array<i64: 1, 1>, scalar_prefetch = 0 : i64, scratch_operands = 1 : i64, tpu.core_type = #tpu.core_type<tc>, window_params = [{transform_indices = @transform_0, window_bounds = array<i64: 16, 128>}, {transform_indices = @transform_1, window_bounds = array<i64: 16, 128>}, {transform_indices = @transform_2, window_bounds = array<i64: 1, 8, 128>}]} {
    %c0_i32 = arith.constant 0 : i32
    %0 = arith.cmpi eq, %arg1, %c0_i32 : i32
    %1 = arith.extui %0 : i1 to i32
    %c0_i32_0 = arith.constant 0 : i32
    %2 = arith.cmpi ne, %1, %c0_i32_0 : i32
    scf.if %2 {
      %cst_19 = arith.constant 0.000000e+00 : f32
      %41 = vector.broadcast %cst_19 : f32 to vector<8x128xf32>
      %c0_20 = arith.constant 0 : index
      %c0_21 = arith.constant 0 : index
      %42 = vector.load %arg5[%c0_20, %c0_21] : memref<8x128xf32, #tpu.memory_space<vmem>>, vector<8x128xf32>
      tpu.vector_store %arg5[%c0_20, %c0_21], %41 {strides = array<i32>} : memref<8x128xf32, #tpu.memory_space<vmem>>, vector<8x128xf32>,
    } else {
    }
    %c0 = arith.constant 0 : index
    %c0_1 = arith.constant 0 : index
    %3 = vector.load %arg2[%c0, %c0_1] : memref<16x128xf32, #tpu.memory_space<vmem>>, vector<16x128xf32>
    %c0_2 = arith.constant 0 : index
    %c0_3 = arith.constant 0 : index
    %4 = vector.load %arg3[%c0_2, %c0_3] : memref<16x128xf32, #tpu.memory_space<vmem>>, vector<16x128xf32>
    %5 = math.absf %3 : vector<16x128xf32>
    %cst = arith.constant 0.000000e+00 : f32
    %6 = vector.broadcast %cst : f32 to vector<16x128xf32>
    %7 = arith.subf %6, %5 : vector<16x128xf32>
    %8 = math.exp %7 : vector<16x128xf32>
    %cst_4 = arith.constant 0.000000e+00 : f32
    %9 = vector.broadcast %cst_4 : f32 to vector<16x128xf32>
    %10 = arith.maximumf %3, %9 : vector<16x128xf32>
    %11 = arith.mulf %3, %4 : vector<16x128xf32>
    %12 = arith.subf %10, %11 : vector<16x128xf32>
    %cst_5 = arith.constant 1.000000e+00 : f32
    %13 = vector.broadcast %cst_5 : f32 to vector<16x128xf32>
    %14 = arith.addf %13, %8 : vector<16x128xf32>
    %15 = math.log %14 : vector<16x128xf32>
    %16 = arith.addf %12, %15 : vector<16x128xf32>
    %cst_6 = arith.constant 5.000000e-01 : f32
    %17 = vector.broadcast %cst_6 : f32 to vector<16x128xf32>
    %18 = arith.mulf %17, %3 : vector<16x128xf32>
    %19 = math.tanh %18 : vector<16x128xf32>
    %cst_7 = arith.constant 5.000000e-01 : f32
    %20 = vector.broadcast %cst_7 : f32 to vector<16x128xf32>
    %21 = arith.mulf %20, %19 : vector<16x128xf32>
    %cst_8 = arith.constant 5.000000e-01 : f32
    %22 = vector.broadcast %cst_8 : f32 to vector<16x128xf32>
    %23 = arith.addf %21, %22 : vector<16x128xf32>
    %24 = arith.subf %23, %4 : vector<16x128xf32>
    %cst_9 = arith.constant 1.000000e+00 : f32
    %25 = vector.broadcast %cst_9 : f32 to vector<16x128xf32>
    %26 = arith.subf %24, %25 : vector<16x128xf32>
    %cst_10 = arith.constant 19.9600792 : f32
    %27 = vector.broadcast %cst_10 : f32 to vector<16x128xf32>
    %28 = arith.mulf %26, %27 : vector<16x128xf32>
    %29 = math.exp %28 : vector<16x128xf32>
    %cst_11 = arith.constant 1.000000e+00 : f32
    %30 = vector.broadcast %cst_11 : f32 to vector<16x128xf32>
    %31 = arith.subf %30, %29 : vector<16x128xf32>
    %32 = arith.mulf %16, %31 : vector<16x128xf32>
    %c0_12 = arith.constant 0 : index
    %c0_13 = arith.constant 0 : index
    %33 = vector.load %arg5[%c0_12, %c0_13] : memref<8x128xf32, #tpu.memory_space<vmem>>, vector<8x128xf32>
    %34 = vector.shape_cast %32 : vector<16x128xf32> to vector<2x8x128xf32>
    %cst_14 = arith.constant dense<0.000000e+00> : vector<8x128xf32>
    %35 = vector.multi_reduction <add>, %34, %cst_14 [0] : vector<2x8x128xf32> to vector<8x128xf32>
    %36 = arith.addf %33, %35 : vector<8x128xf32>
    %c0_15 = arith.constant 0 : index
    %c0_16 = arith.constant 0 : index
    %37 = vector.load %arg5[%c0_15, %c0_16] : memref<8x128xf32, #tpu.memory_space<vmem>>, vector<8x128xf32>
    tpu.vector_store %arg5[%c0_15, %c0_16], %36 {strides = array<i32>} : memref<8x128xf32, #tpu.memory_space<vmem>>, vector<8x128xf32>,
    %c0_i32_17 = arith.constant 0 : i32
    %38 = arith.cmpi eq, %arg1, %c0_i32_17 : i32
    %39 = arith.extui %38 : i1 to i32
    %c0_i32_18 = arith.constant 0 : i32
    %40 = arith.cmpi ne, %39, %c0_i32_18 : i32
    scf.if %40 {
      %c0_19 = arith.constant 0 : index
      %c0_20 = arith.constant 0 : index
      %41 = vector.load %arg5[%c0_19, %c0_20] : memref<8x128xf32, #tpu.memory_space<vmem>>, vector<8x128xf32>
      %c0_21 = arith.constant 0 : index
      %c0_22 = arith.constant 0 : index
      %c0_23 = arith.constant 0 : index
      %42 = vector.load %arg4[%c0_21, %c0_22, %c0_23] : memref<1x8x128xf32, #tpu.memory_space<vmem>>, vector<1x8x128xf32>
      %43 = vector.shape_cast %42 : vector<1x8x128xf32> to vector<8x128xf32>
      %44 = vector.shape_cast %41 : vector<8x128xf32> to vector<1x8x128xf32>
      tpu.vector_store %arg4[%c0_21, %c0_22, %c0_23], %44 {strides = array<i32>} : memref<1x8x128xf32, #tpu.memory_space<vmem>>, vector<1x8x128xf32>,
    } else {
    }
    return
  }
  func.func @transform_0(%arg0: i32, %arg1: i32) -> (i32, i32) {
    %c1_i32 = arith.constant 1 : i32
    %0 = arith.muli %arg0, %c1_i32 : i32
    %1 = arith.addi %0, %arg1 : i32
    %c0_i32 = arith.constant 0 : i32
    %2 = arith.minsi %1, %c0_i32 : i32
    %c0_i32_0 = arith.constant 0 : i32
    %c0_i32_1 = arith.constant 0 : i32
    return %2, %c0_i32_0 : i32, i32
  }
  func.func @transform_1(%arg0: i32, %arg1: i32) -> (i32, i32) {
    %c1_i32 = arith.constant 1 : i32
    %0 = arith.muli %arg0, %c1_i32 : i32
    %1 = arith.addi %0, %arg1 : i32
    %c0_i32 = arith.constant 0 : i32
    %2 = arith.minsi %1, %c0_i32 : i32
    %c0_i32_0 = arith.constant 0 : i32
    %c0_i32_1 = arith.constant 0 : i32
    return %2, %c0_i32_0 : i32, i32
  }
  func.func @transform_2(%arg0: i32, %arg1: i32) -> (i32, i32, i32) {
    %c0_i32 = arith.constant 0 : i32
    %c0_i32_0 = arith.constant 0 : i32
    %c0_i32_1 = arith.constant 0 : i32
    return %arg0, %c0_i32, %c0_i32_0 : i32, i32, i32
  }
}

</mosaic_0001>

<bundles_post_ra>
// kernel: tpu_custom_call.1
= control target key start
LH: loop header
LB: loop body
LE: loop exit
PB: predicated region body
PF: predicated region fallthrough
CT: control target
= control target key end

     0   :  { %7 = vsyncpa [#allocation4], 0  ;;  %s293_s0 = inlined_call_operand.hbm [shape: f32[16,128], index: 0, kind: input, shape index: {}]   ;;  %s294_s1 = inlined_call_operand.hbm [shape: f32[16,128], index: 1, kind: input, shape index: {}]   ;;  %s295_s2 = inlined_call_operand.hbm [shape: f32[1,8,128], index: 2, kind: output, shape index: {}]  }
   0x1   :  { %8 = vsyncpa [#allocation7], 0 }
   0x2   :  { %9 = vsyncpa [#allocation5], 0  ;;  %s237_s9 = smov [#allocation3]   ;;  %s165_s13 = scalar_lea.hbm %s293_s0, 256 }
   0x3   :  { %s21_s10 = sshll.u32 %s237_s9, 4  ;;  %p166_p0 = scmp.ne.s32.totalorder %s293_s0, %s165_s13  ;;  %s22_s10 = int_to_ptr.vmem [resolvable:$true] %s21_s10 }
   0x4   :  { %p169_p1 = scmp.lt.u32.totalorder %s165_s13, %s293_s0 }
   0x6   :  { %p171_p2 = pnand %p169_p1, %p166_p0 }
   0x8   :  { %174 = shalt.err (!%p171_p2)
}
   0x9   :  { %s175_s18 = scalar_lea.vmem %s22_s10, 256  ;;  %p180_p4 = scmp.lt.s32.totalorder %s22_s10, %s22_s10 }
   0xa   :  { %p176_p3 = scmp.ne.s32.totalorder %s22_s10, %s175_s18  ;;  %p181_p5 = scmp.lt.s32.totalorder %s175_s18, %s175_s18 }
   0xc   :  { %p182_p6 = por %p181_p5, %p180_p4 }
   0xe   :  { %p183_p7 = pnand %p182_p6, %p176_p3 }
  0x10   :  { %186 = shalt.err (!%p183_p7)
}
  0x11   :  { %s238_s19 = smov 128   ;;  %s239_s20 = smov 8  }
  0x12   :  { %27 = dma.hbm_to_vmem [thread:$0]  %s293_s0, 256, %s22_s10, [#allocation4], %s238_s19, %s238_s19, %s239_s20  }
  0x13   :  { %s240_s23 = smov [#allocation6]   ;;  %s187_s27 = scalar_lea.hbm %s294_s1, 256 }
  0x14   :  { %s39_s24 = sshll.u32 %s240_s23, 4  ;;  %p188_p8 = scmp.ne.s32.totalorder %s294_s1, %s187_s27  ;;  %s40_s24 = int_to_ptr.vmem [resolvable:$true] %s39_s24 }
  0x15   :  { %p191_p9 = scmp.lt.u32.totalorder %s187_s27, %s294_s1 }
  0x17   :  { %p193_p10 = pnand %p191_p9, %p188_p8 }
  0x19   :  { %196 = shalt.err (!%p193_p10)
}
  0x1a   :  { %s197_s4 = scalar_lea.vmem %s40_s24, 256  ;;  %p202_p12 = scmp.lt.s32.totalorder %s40_s24, %s40_s24 }
  0x1b   :  { %p198_p11 = scmp.ne.s32.totalorder %s40_s24, %s197_s4  ;;  %p203_p13 = scmp.lt.s32.totalorder %s197_s4, %s197_s4 }
  0x1d   :  { %p204_p0 = por %p203_p13, %p202_p12 }
  0x1f   :  { %p205_p1 = pnand %p204_p0, %p198_p11 }
  0x21   :  { %208 = shalt.err (!%p205_p1)
}
  0x22   :  { %45 = dma.hbm_to_vmem [thread:$0]  %s294_s1, 256, %s40_s24, [#allocation7], %s238_s19, %s238_s19, %s239_s20  }
  0x23   :  { %231 = dma.done.wait [#allocation4], 256  }
  0x24   :  { %232 = vsyncadd [#allocation4], 4294967040 }
  0x25   :  { %233 = dma.done.wait [#allocation7], 256  }
  0x26   :  { %234 = vsyncadd [#allocation7], 4294967040  ;;  %v65_v0 = vld [vmem:[#allocation3] sm:$0xff]  ;;  %v66_v1 = vld [vmem:[#allocation3 + $0x8] sm:$0xff]  ;;  %s241_s1 = smov [#allocation8]  }
  0x27   :  { %v69_v2 = vand.u32 2147483647, %v65_v0  ;;  %v70_v3 = vand.u32 2147483647, %v66_v1  ;;  %v91_v4 = vmul.f32 0.5, %v65_v0  ;;  %v92_v5 = vmul.f32 0.5, %v66_v1 }
  0x28   :  { %v67_v13 = vld [vmem:[#allocation6] sm:$0xff]  ;;  %v68_v16 = vld [vmem:[#allocation6 + $0x8] sm:$0xff]  ;;  %v77_v30 = vmax.f32 %v65_v0, 0.0  ;;  %v78_v32 = vmax.f32 %v66_v1, 0.0  ;;  %s128_s6 = sshll.u32 %s241_s1, 4  ;;  %s129_s6 = int_to_ptr.vmem [resolvable:$true] %s128_s6 }
  0x29   :  { %v71_v6 = vsub.f32 0.0, %v69_v2  ;;  %v72_v7 = vsub.f32 0.0, %v70_v3  ;;  %149 = vtanh.f32 %v91_v4  ;;  %v79_v31 = vmul.f32 %v67_v13, %v65_v0  ;;  %s209_s7 = scalar_lea.vmem %s129_s6, 128  ;;  %p214_p3 = scmp.lt.s32.totalorder %s129_s6, %s129_s6 }
  0x2a   :  { %151 = vtanh.f32 %v92_v5  ;;  %v80_v33 = vmul.f32 %v68_v16, %v66_v1  ;;  %p210_p2 = scmp.ne.s32.totalorder %s129_s6, %s209_s7  ;;  %p215_p4 = scmp.lt.s32.totalorder %s209_s7, %s209_s7 }
  0x2b   :  { %v73_v8 = vmul.f32 1.442695, %v71_v6  ;;  %v75_v9 = vmul.f32 1.442695, %v72_v7  ;;  %v81_v36 = vsub.f32 %v77_v30, %v79_v31 }
  0x2c   :  { %v82_v38 = vsub.f32 %v78_v32, %v80_v33  ;;  %p216_p5 = por %p215_p4, %p214_p3 }
  0x2d   :  { %153 = vpow2.f32 %v73_v8 }
  0x2e   :  { %155 = vpow2.f32 %v75_v9  ;;  %p217_p6 = pnand %p216_p5, %p210_p2 }
  0x33   :  { %v150_v10 = vpop.eup %149 }
  0x34   :  { %v152_v11 = vpop.eup %151  ;;  %v95_v12 = vmul.f32 0.5, %v150_v10 }
  0x35   :  { %v96_v14 = vmul.f32 0.5, %v152_v11 }
  0x36   :  { %v97_v17 = vadd.f32 0.5, %v95_v12 }
  0x37   :  { %v154_v15 = vpop.eup %153  ;;  %v98_v20 = vadd.f32 0.5, %v96_v14 }
  0x38   :  { %v156_v18 = vpop.eup %155  ;;  %v83_v19 = vadd.f32 1.0, %v154_v15  ;;  %v99_v22 = vsub.f32 %v97_v17, %v67_v13 }
  0x39   :  { %v84_v21 = vadd.f32 1.0, %v156_v18  ;;  %v100_v23 = vsub.f32 %v98_v20, %v68_v16 }
  0x3a   :  { %157 = vlog2.f32 %v83_v19  ;;  %v142_v24 = vadd.f32 -1.0, %v99_v22 }
  0x3b   :  { %159 = vlog2.f32 %v84_v21  ;;  %v143_v25 = vadd.f32 -1.0, %v100_v23 }
  0x3c   :  { %v103_v26 = vmul.f32 19.96008, %v142_v24 }
  0x3d   :  { %v104_v27 = vmul.f32 19.96008, %v143_v25 }
  0x3e   :  { %v105_v28 = vmul.f32 1.442695, %v103_v26 }
  0x3f   :  { %v107_v29 = vmul.f32 1.442695, %v104_v27 }
  0x40   :  { %161 = vpow2.f32 %v105_v28 }
  0x41   :  { %163 = vpow2.f32 %v107_v29 }
  0x44   :  { %v158_v34 = vpop.eup %157 }
  0x45   :  { %v160_v35 = vpop.eup %159  ;;  %v86_v37 = vmul.f32 0.6931472, %v158_v34 }
  0x46   :  { %v88_v39 = vmul.f32 0.6931472, %v160_v35 }
  0x47   :  { %v89_v40 = vadd.f32 %v86_v37, %v81_v36 }
  0x48   :  { %v90_v42 = vadd.f32 %v88_v39, %v82_v38 }
  0x4a   :  { %v162_v41 = vpop.eup %161 }
  0x4b   :  { %v164_v43 = vpop.eup %163  ;;  %v109_v44 = vsub.f32 1.0, %v162_v41 }
  0x4c   :  { %v110_v45 = vsub.f32 1.0, %v164_v43 }
  0x4d   :  { %v111_v46 = vmul.f32 %v109_v44, %v89_v40 }
  0x4e   :  { %v112_v47 = vmul.f32 %v110_v45, %v90_v42 }
  0x50   :  { %v114_v48 = vadd.f32 %v112_v47, %v111_v46 }
  0x52   :  { %121 = vst [vmem:[#allocation8] sm:$0xff] %v114_v48 }
  0x53   :  { %220 = shalt.err (!%p217_p6)
}
  0x54   :  { %s221_s10 = scalar_lea.hbm %s295_s2, 128 }
  0x55   :  { %p222_p7 = scmp.ne.s32.totalorder %s295_s2, %s221_s10  ;;  %p225_p8 = scmp.lt.u32.totalorder %s221_s10, %s295_s2 }
  0x57   :  { %p227_p9 = pnand %p225_p8, %p222_p7 }
  0x59   :  { %230 = shalt.err (!%p227_p9)
}
  0x5a   :  { %131 = dma.vmem_to_hbm [thread:$0]  %s129_s6, 128, %s295_s2, [#allocation5]  }
  0x5b   :  { %235 = dma.done.wait [#allocation5], 128  }
  0x5c   :  { %236 = vsyncadd [#allocation5], 4294967168 }
  0x5d   :  { %135 = vsyncpa [#allocation4], 1 }
  0x5e   :  { %136 = vsyncpa [#allocation7], 1 }
  0x5f   :  { %137 = vsyncpa [#allocation5], 1 }

</bundles_post_ra>
